<compile_context>
chip_gen: v7x
topology: tpu7x:2x2x1
jax: 0.10.0
libtpu: 0.0.40
codegen_flags: <defaults>
</compile_context>

<pallas_src>
import functools

import jax
import jax.numpy as jnp
from jax.experimental import pallas as pl
from jax.experimental.pallas import tpu as pltpu


# ----------------------------------------------------------------------------
# kernel
# ----------------------------------------------------------------------------

def _eca_kernel(w_ref, x_ref, o_ref, *, inv_hw, k):
    """Fused ECA forward for one batch element.

    w_ref : (k,)       f32 in SMEM   -- Conv1d(1, 1, k, bias=False) weights
    x_ref : (1, C, HW) in VMEM       -- one batch element, spatial dims flattened
    o_ref : (1, C, HW) in VMEM
    """
    x = x_ref[0]                                                     # (C, HW)

    # 1) global average pool over the lane-dense spatial axis (XLU reduction).
    y = jnp.sum(x, axis=-1, keepdims=True).astype(jnp.float32) * inv_hw   # (C, 1)

    # 2) k-tap conv along the channel axis on the pooled vector:
    #    z[i] = sum_t w[t] * y[i + t - pad]   (zero padded; PyTorch Conv1d
    #    cross-correlation semantics).  k shifted multiply-adds on a (C, 1)
    #    vector -- negligible next to the x*s scale pass.
    c = x.shape[0]
    pad = (k - 1) // 2
    if pad > 0:
        zpad = jnp.zeros((pad, 1), jnp.float32)
        yp = jnp.concatenate([zpad, y, zpad], axis=0)                # (C + 2*pad, 1)
    else:
        yp = y
    z = w_ref[0] * yp[0:c]
    for t in range(1, k):                                            # k is small & static
        z = z + w_ref[t] * yp[t:t + c]

    # 3) sigmoid gate (EUP) + broadcast scale over the lane-dense spatial axis.
    s = jax.nn.sigmoid(z)                                            # (C, 1) f32
    o_ref[0] = (x * s.astype(x.dtype)).astype(o_ref.dtype)


# ----------------------------------------------------------------------------
# wrapper / glue
# ----------------------------------------------------------------------------

def eca_forward(x, conv_w):
    """x: (B, C, H, W), conv_w: (k,) Conv1d(1,1,k,bias=False) weight. Returns (B, C, H, W)."""
    b, c, h, w = x.shape
    hw = h * w
    k = int(conv_w.shape[0])
    xf = x.reshape(b, c, hw)                         # metadata-only, no copy

    out = pl.pallas_call(
        functools.partial(_eca_kernel, inv_hw=1.0 / hw, k=k),
        out_shape=jax.ShapeDtypeStruct((b, c, hw), x.dtype),
        grid=(b,),
        in_specs=[
            # tiny (k,) weight vector lives in SMEM (scalar reads in the kernel)
            pl.BlockSpec(memory_space=pltpu.MemorySpace.SMEM),
            # full-extent block: equals the array dims, so (8,128) rule is satisfied
            pl.BlockSpec((1, c, hw), lambda i: (i, 0, 0)),
        ],
        out_specs=pl.BlockSpec((1, c, hw), lambda i: (i, 0, 0)),
        compiler_params=pltpu.CompilerParams(
            dimension_semantics=("parallel",)),
    )(conv_w.astype(jnp.float32), xf)

    return out.reshape(b, c, h, w)


# ----------------------------------------------------------------------------
# pure-JAX reference (mirrors the PyTorch module exactly)
# ----------------------------------------------------------------------------

def eca_reference(x, conv_w):
    b, c, h, w = x.shape
    k = conv_w.shape[0]
    pad = (k - 1) // 2
    y = jnp.mean(x, axis=(2, 3))                                # (B, C) = AdaptiveAvgPool2d(1)
    yp = jnp.pad(y, ((0, 0), (pad, pad)))
    z = sum(conv_w[j] * yp[:, j:j + c] for j in range(k))       # Conv1d over channels
    s = 1.0 / (1.0 + jnp.exp(-z))
    return x * s[:, :, None, None]


# ----------------------------------------------------------------------------

if __name__ == "__main__":
    key = jax.random.PRNGKey(0)
    kx, kw = jax.random.split(key)

    B, C, H, W = 2, 32, 16, 16          # (batch, channels, height, width)
    K_SIZE = 3                          # ECA kernel size
    x = jax.random.normal(kx, (B, C, H, W), jnp.float32)
    conv_w = jax.random.normal(kw, (K_SIZE,), jnp.float32)  # Conv1d(1,1,3,bias=False).weight

    out = jax.block_until_ready(eca_forward(x, conv_w))

    assert out.shape == (B, C, H, W), out.shape
    assert bool(jnp.all(jnp.isfinite(out)))
    ref = eca_reference(x, conv_w)
    assert bool(jnp.allclose(out, ref, atol=1e-4, rtol=1e-4)), \
        float(jnp.max(jnp.abs(out - ref)))
    print("KERNEL_OK")
</pallas_src>

<mosaic_0001>
module attributes {stable_mosaic.version = 11 : i64} {
  func.func @_eca_kernel(%arg0: i32, %arg1: memref<3xf32, #tpu.memory_space<smem>>, %arg2: memref<1x32x256xf32, #tpu.memory_space<vmem>>, %arg3: memref<1x32x256xf32, #tpu.memory_space<vmem>>) attributes {dimension_semantics = [#tpu.dimension_semantics<parallel>], iteration_bounds = array<i64: 2>, scalar_prefetch = 0 : i64, scratch_operands = 0 : i64, tpu.core_type = #tpu.core_type<tc>, window_params = [{transform_indices = @transform_0, window_bounds = array<i64: 3>}, {transform_indices = @transform_1, window_bounds = array<i64: 1, 32, 256>}, {transform_indices = @transform_2, window_bounds = array<i64: 1, 32, 256>}]} {
    %c0 = arith.constant 0 : index
    %c0_0 = arith.constant 0 : index
    %c0_1 = arith.constant 0 : index
    %0 = vector.load %arg2[%c0, %c0_0, %c0_1] : memref<1x32x256xf32, #tpu.memory_space<vmem>>, vector<1x32x256xf32>
    %1 = vector.shape_cast %0 : vector<1x32x256xf32> to vector<32x256xf32>
    %cst = arith.constant dense<0.000000e+00> : vector<32xf32>
    %2 = vector.multi_reduction <add>, %1, %cst [1] : vector<32x256xf32> to vector<32xf32>
    %3 = vector.shape_cast %2 : vector<32xf32> to vector<32x1xf32>
    %cst_2 = arith.constant 3.906250e-03 : f32
    %4 = vector.broadcast %cst_2 : f32 to vector<32x1xf32>
    %5 = arith.mulf %3, %4 : vector<32x1xf32>
    %cst_3 = arith.constant 0.000000e+00 : f32
    %6 = vector.broadcast %cst_3 : f32 to vector<1x1xf32>
    %7 = tpu.concatenate %6, %5, %6 in 0 : vector<1x1xf32>, vector<32x1xf32>, vector<1x1xf32> -> vector<34x1xf32>
    %c0_4 = arith.constant 0 : index
    %8 = memref.load %arg1[%c0_4] : memref<3xf32, #tpu.memory_space<smem>>
    %9 = vector.extract_strided_slice %7 {offsets = [0, 0], sizes = [32, 1], strides = [1, 1]} : vector<34x1xf32> to vector<32x1xf32>
    %10 = vector.broadcast %8 : f32 to vector<32x1xf32>
    %11 = arith.mulf %10, %9 : vector<32x1xf32>
    %c1 = arith.constant 1 : index
    %12 = memref.load %arg1[%c1] : memref<3xf32, #tpu.memory_space<smem>>
    %13 = vector.extract_strided_slice %7 {offsets = [1, 0], sizes = [32, 1], strides = [1, 1]} : vector<34x1xf32> to vector<32x1xf32>
    %14 = vector.broadcast %12 : f32 to vector<32x1xf32>
    %15 = arith.mulf %14, %13 : vector<32x1xf32>
    %16 = arith.addf %11, %15 : vector<32x1xf32>
    %c2 = arith.constant 2 : index
    %17 = memref.load %arg1[%c2] : memref<3xf32, #tpu.memory_space<smem>>
    %18 = vector.extract_strided_slice %7 {offsets = [2, 0], sizes = [32, 1], strides = [1, 1]} : vector<34x1xf32> to vector<32x1xf32>
    %19 = vector.broadcast %17 : f32 to vector<32x1xf32>
    %20 = arith.mulf %19, %18 : vector<32x1xf32>
    %21 = arith.addf %16, %20 : vector<32x1xf32>
    %22 = arith.negf %21 : vector<32x1xf32>
    %23 = math.exp %22 : vector<32x1xf32>
    %cst_5 = arith.constant 1.000000e+00 : f32
    %24 = vector.broadcast %cst_5 : f32 to vector<32x1xf32>
    %25 = arith.addf %24, %23 : vector<32x1xf32>
    %26 = arith.divf %24, %25 : vector<32x1xf32>
    %27 = vector.broadcast %26 : vector<32x1xf32> to vector<32x256xf32>
    %28 = arith.mulf %1, %27 : vector<32x256xf32>
    %c0_6 = arith.constant 0 : index
    %c0_7 = arith.constant 0 : index
    %c0_8 = arith.constant 0 : index
    %29 = vector.load %arg3[%c0_6, %c0_7, %c0_8] : memref<1x32x256xf32, #tpu.memory_space<vmem>>, vector<1x32x256xf32>
    %30 = vector.shape_cast %29 : vector<1x32x256xf32> to vector<32x256xf32>
    %31 = vector.shape_cast %28 : vector<32x256xf32> to vector<1x32x256xf32>
    tpu.vector_store %arg3[%c0_6, %c0_7, %c0_8], %31 {strides = array<i32>} : memref<1x32x256xf32, #tpu.memory_space<vmem>>, vector<1x32x256xf32>,
    return
  }
  func.func @transform_0(%arg0: i32) -> i32 {
    %c0_i32 = arith.constant 0 : i32
    %c0_i32_0 = arith.constant 0 : i32
    return %c0_i32 : i32
  }
  func.func @transform_1(%arg0: i32) -> (i32, i32, i32) {
    %c0_i32 = arith.constant 0 : i32
    %c0_i32_0 = arith.constant 0 : i32
    %c0_i32_1 = arith.constant 0 : i32
    return %arg0, %c0_i32, %c0_i32_0 : i32, i32, i32
  }
  func.func @transform_2(%arg0: i32) -> (i32, i32, i32) {
    %c0_i32 = arith.constant 0 : i32
    %c0_i32_0 = arith.constant 0 : i32
    %c0_i32_1 = arith.constant 0 : i32
    return %arg0, %c0_i32, %c0_i32_0 : i32, i32, i32
  }
}

</mosaic_0001>

<bundles_post_ra>
// kernel: tpu_custom_call.1
= control target key start
LH: loop header
LB: loop body
LE: loop exit
PB: predicated region body
PF: predicated region fallthrough
CT: control target
= control target key end

     0   :  { %7 = vsyncpa [#allocation5], 0  ;;  %s923_s0 = inlined_call_operand.hbm [shape: f32[3], index: 0, kind: input, shape index: {}]   ;;  %s924_s1 = inlined_call_operand.hbm [shape: f32[2,32,256], index: 1, kind: input, shape index: {}]   ;;  %s925_s2 = inlined_call_operand.hbm [shape: f32[2,32,256], index: 2, kind: output, shape index: {}]  }
   0x1   :  { %8 = vsyncpa [#allocation3], 0 }
   0x2   :  { %10 = vsyncpa [#allocation3 + $0x1], 0 }
   0x3   :  { %11 = vsyncpa [#allocation4], 0 }
   0x4   :  { %13 = vsyncpa [#allocation4 + $0x1], 0  ;;  %s684_s9 = smov 0   ;;  %s686_s10 = smov 0  }
   0x5   :  { %s688_s11 = smov 0   ;;  %s690_s12 = smov 0  }
   0x6 LB: > { %s705_s13 = sadd.s32 4294967295, %s659_s12   ;;  %s442_s14 = sadd.s32 4294967294, %s659_s12   ;;  %s659_s12 = sphi %s690_s12, %s945_s12   ;;  %s655_s11 = sphi %s688_s11, %s944_s11   ;;  %s651_s10 = sphi %s686_s10, %s943_s10   ;;  %s647_s9 = sphi %s684_s9, %s942_s9  }
   0x7   : > { %s709_s15 = sadd.s32 1, %s659_s12   ;;  %s47_s16 = sadd.s32 1, %s655_s11 }
   0x8   : > { %s44_s17 = ssub.s32 %s659_s12, %s709_s15  ;;  %p54_p0 = scmp.ne.s32.totalorder %s655_s11, %s651_s10 }
   0x9   : > { %p45_p1 = scmp.eq.s32.totalorder %s44_s17, 0  ;;  %p55_p2 = scmp.eq.s32.totalorder %s659_s12, 0 }
   0xa   : > { %p60_p3 = scmp.ne.s32.totalorder %s651_s10, %s647_s9  ;;  %p926_p4 = scmp.eq.s32.totalorder %s705_s13, 0 }
   0xb   : > { %s721_s18 = scalar_select %p45_p1, %s655_s11, %s47_s16  }
   0xc   : > { %p723_p5 = por %p55_p2, %p54_p0  ;;  %p729_p6 = por %p926_p4, %p60_p3 }
   0xd   : > { %p84_p7 = scmp.eq.s32.totalorder %s705_s13, 1  ;;  %p90_p8 = scmp.eq.s32.totalorder %s442_s14, 1 }
   0xe   : > { %s930_s20 = scalar_select %p729_p6, 1, 0 }
   0xf   : > { %p443_p9 = scmp.ge.s32.totalorder %s659_s12, 1  ;;  %p97_p10 = scmp.lt.s32.totalorder %s659_s12, 3 }
  0x10   : > { %p736_p11 = por %p84_p7, %p54_p0  ;;  %p740_p12 = por %p90_p8, %p60_p3 }
  0x11   : > { %p744_p13 = pnand %p443_p9, %p97_p10  ;;  %p487_p4 = scmp.lt.s32.totalorder %s659_s12, 2 }
  0x12   : > { %s931_s21 = scalar_select %p736_p11, 1, 0 }
  0x13   : > { %s932_s22 = scalar_select %p740_p12, 1, 0 }
  0x14   : > { %p474_p2 = pneg %p744_p13  ;;  %s119_s24 = sand.u32 1, %s655_s11  }
  0x15   : > { %s464_s25 = sshll.u32 %s659_s12, 10  ;;  %p934_p6 = scmp.eq.s32.totalorder %s705_s13, 0 }
  0x16   : > { %p758_p7 = pnand %p487_p4, %p723_p5  ;;  %s446_s27 = sshll.u32 %s119_s24, 6 }
  0x17   : > { %p475_p0 = pnand %p474_p2, %p934_p6  ;;  %s546_s30 = scalar_lea.hbm %s923_s0, 16 }
  0x18   : > { %p547_p3 = scmp.ne.s32.totalorder %s923_s0, %s546_s30  ;;  %p553_p6 = scmp.lt.u32.totalorder %s546_s30, %s923_s0 }
  0x19   : > { %p548_p8 = pneg %p475_p0 }
  0x1b   : > { %p549_p9 = pnand %p548_p8, %p547_p3 }
  0x1d   : > { %p550_p10 = pneg %p549_p9 }
  0x1f   : > { %p555_p4 = pnand %p553_p6, %p550_p10 }
  0x21   : > { %558 = shalt.err (!%p555_p4)
}
  0x22   : > { %s661_s7 = smov [#allocation2]   ;;  %s777_s19 = scalar_lea.hbm %s924_s1, %s464_s25 }
  0x23   : > { %477 = dma.hbm_to_smem (!%p475_p0), %s923_s0, 16, %s661_s7, [#allocation5]  }
  0x24   : > { %s123_s28 = scalar_lea.vmem [#allocation6], %s446_s27  ;;  %s781_s30 = scalar_lea.sflag [#allocation3], %s119_s24 }
  0x25   : > { %s130_s29 = sshll.u32 %s123_s28, 4  ;;  %s559_s3 = scalar_lea.hbm %s777_s19, 1024  ;;  %s779_s29 = int_to_ptr.vmem [resolvable:$true] %s130_s29 }
  0x26   : > { %p560_p5 = scmp.ne.s32.totalorder %s777_s19, %s559_s3  ;;  %p561_p2 = pneg %p758_p7 }
  0x27   : > { %s564_s5 = scalar_lea.hbm %s924_s1, 2048  ;;  %p565_p8 = scmp.lt.u32.totalorder %s777_s19, %s924_s1 }
  0x28   : > { %p562_p0 = pnand %p561_p2, %p560_p5  ;;  %p566_p9 = scmp.lt.u32.totalorder %s564_s5, %s559_s3 }
  0x29   : > { %p568_p6 = scmp.lt.u32.totalorder %s559_s3, %s777_s19 }
  0x2a   : > { %p563_p3 = pneg %p562_p0  ;;  %p567_p10 = por %p566_p9, %p565_p8 }
  0x2c   : > { %p569_p4 = por %p568_p6, %p567_p10 }
  0x2e   : > { %p570_p1 = pnand %p569_p4, %p563_p3 }
  0x30   : > { %573 = shalt.err (!%p570_p1)
}
  0x31   : > { %s574_s24 = scalar_lea.vmem %s779_s29, 1024  ;;  %s662_s27 = smov [#allocation6]  }
  0x32   : > { %p575_p5 = scmp.ne.s32.totalorder %s779_s29, %s574_s24  ;;  %s579_s8 = sshll.u32 %s662_s27, 4  ;;  %s580_s8 = int_to_ptr.vmem [resolvable:$false] %s579_s8 }
  0x33   : > { %s581_s14 = scalar_lea.vmem %s580_s8, 2048  ;;  %p582_p11 = scmp.lt.s32.totalorder %s779_s29, %s580_s8 }
  0x34   : > { %p577_p0 = pnand %p575_p5, %p561_p2  ;;  %p583_p8 = scmp.lt.s32.totalorder %s581_s14, %s574_s24 }
  0x36   : > { %p578_p12 = pneg %p577_p0  ;;  %p584_p9 = por %p583_p8, %p582_p11 }
  0x38   : > { %p585_p10 = pnand %p584_p9, %p578_p12 }
  0x3a   : > { %588 = shalt.err (!%p585_p10)
}
  0x3b   : > { %s663_s16 = smov 256   ;;  %s664_s17 = smov 16  }
  0x3c   : > { %481 = dma.hbm_to_vmem [thread:$0]  (!%p758_p7), %s777_s19, 1024, %s779_s29, %s781_s30, %s663_s16, %s663_s16, %s664_s17  }
  0x3d   : > { %142 = sbr.rel (%p744_p13) target bundleno = 419 (0x1a3), region = 28  ;;  %p936_p1 = scmp.eq.s32.totalorder (!%p744_p13), %s705_s13, 0 }
  0x44   : > { %634 = dma.done.wait (%p936_p1), [#allocation5], 16   ;;  %p937_p2 = pmov %p936_p1 }
  0x45   : > { %s816_s28 = sand.u32 1, %s651_s10   ;;  %p938_p11 = scmp.ne.s32.totalorder %s930_s20, 0 }
  0x46   : > { %636 = vsyncadd (%p937_p2), [#allocation5], 4294967280  ;;  %s451_s3 = sshll.u32 %s816_s28, 6  ;;  %s149_s25 = scalar_lea.sflag [#allocation3], %s816_s28 }
  0x47   : > { %s152_s26 = scalar_lea.vmem [#allocation6], %s451_s3 }
  0x48   : > { %638 = dma.done.wait (%p938_p11), %s149_s25, 1024  }
  0x49   : > { %640 = vsyncadd (%p938_p11), %s149_s25, 4294966272 }
  0x4a   : > { %157 = sfence }
  0x4b   : > { %v826_v0 = vld [vmem:[%s152_s26 + $0x20] sm:$0xff]  ;;  %v828_v1 = vld [vmem:[%s152_s26 + $0x28] sm:$0xff]  ;;  %v836_v5 = vld [vmem:[%s152_s26 + $0x30] sm:$0xff]  ;;  %v665_v12 = vmov 0   ;;  %s453_s20 = sld [smem:[#allocation2 + $0x1]]  ;;  %s454_s23 = sld [smem:[#allocation2 + $0x2]] }
  0x4c   : > { %v830_v2 = vld [vmem:[%s152_s26] sm:$0xff]  ;;  %v188_v3 = vadd.f32 %v828_v1, %v826_v0  ;;  %v834_v4 = vld [vmem:[%s152_s26 + $0x8] sm:$0xff]  ;;  %v838_v6 = vld [vmem:[%s152_s26 + $0x38] sm:$0xff]  ;;  %529 = vset.pattern.permute.xlu1 %v665_v12  ;;  %528 = vset.pattern.permute.xlu0 %v665_v12  ;;  %s217_s19 = sld [smem:[#allocation2]]  ;;  %vm202_vm0 = vcmask 1040384   ;;  %vm235_vm1 = vcmask 1046528  }
  0x4d   : > { %v182_v7 = vadd.f32 %v834_v4, %v830_v2  ;;  %v842_v8 = vld [vmem:[%s152_s26 + $0x10] sm:$0xff]  ;;  %v844_v9 = vld [vmem:[%s152_s26 + $0x18] sm:$0xff]  ;;  %v191_v10 = vadd.f32 %v838_v6, %v836_v5  ;;  %vm265_vm2 = vcmask 1045504   ;;  %s173_s29 = scalar_lea.vmem [#allocation7], %s451_s3  ;;  %s465_s30 = sshll.u32 %s705_s13, 10 }
  0x4e   : > { %189 = vadd.xlane.f32.xlu1 %v188_v3  ;;  %v185_v11 = vadd.f32 %v844_v9, %v842_v8  ;;  %s357_s4 = sshll.u32 %s173_s29, 4  ;;  %s875_s7 = scalar_lea.hbm %s925_s2, %s465_s30  ;;  %s877_s4 = int_to_ptr.vmem [resolvable:$true] %s357_s4 }
  0x4f   : > { %183 = vadd.xlane.f32.xlu0 %v182_v7  ;;  %s344_s13 = scalar_lea.sflag [#allocation4], %s816_s28  ;;  %s589_s24 = scalar_lea.vmem %s877_s4, 1024 }
  0x50   : > { %p590_p12 = scmp.ne.s32.totalorder %s877_s4, %s589_s24  ;;  %p939_p13 = scmp.ne.s32.totalorder %s931_s21, 0 }
  0x51   : > { %v224_v22 = vstv %s453_s20  ;;  %v254_v23 = vstv %s454_s23  ;;  %s666_s27 = smov [#allocation7]  }
  0x52   : > { %192 = vadd.xlane.f32.xlu1 %v191_v10  ;;  %v218_v27 = vstv %s217_s19  ;;  %p591_p7 = pnand %p590_p12, %p939_p13  ;;  %s593_s8 = sshll.u32 %s666_s27, 4  ;;  %s594_s8 = int_to_ptr.vmem [resolvable:$false] %s593_s8 }
  0x53   : > { %186 = vadd.xlane.f32.xlu0 %v185_v11  ;;  %s595_s14 = scalar_lea.vmem %s594_s8, 2048  ;;  %p596_p6 = scmp.lt.s32.totalorder %s877_s4, %s594_s8 }
  0x54   : > { %p592_p3 = pneg %p591_p7  ;;  %p597_p4 = scmp.lt.s32.totalorder %s595_s14, %s589_s24 }
  0x56   : > { %p598_p5 = por %p597_p4, %p596_p6 }
  0x58   : > { %p599_p0 = pnand %p598_p5, %p592_p3 }
  0xdb   : > { %v190_v13 = vpop.xlane.xlu1 %189 }
  0xdc   : > { %v196_v14 = vmul.f32 0.00390625, %v190_v13  ;;  %v184_v15 = vpop.xlane.xlu0 %183 }
  0xdd   : > { %v194_v16 = vmul.f32 0.00390625, %v184_v15 }
  0xde   : > { %v206_v19 = vrot.slane %v196_v14, 7 }
  0xdf   : > { %v203_v17 = vrot.slane %v194_v16, 7  ;;  %v193_v18 = vpop.xlane.xlu1 %192 }
  0xe0   : > { %v197_v20 = vmul.f32 0.00390625, %v193_v18  ;;  %v187_v21 = vpop.xlane.xlu0 %186 }
  0xe1   : > { %v215_v24 = vsel %vm202_vm0, 0.0, %v203_v17  ;;  %v195_v25 = vmul.f32 0.00390625, %v187_v21 }
  0xe2   : > { %v208_v26 = vrot.slane %v197_v20, 7  ;;  %v225_v29 = vmul.f32 %v224_v22, %v215_v24  ;;  %v255_v30 = vmul.f32 %v254_v23, %v215_v24  ;;  %v219_v38 = vmul.f32 %v218_v27, %v215_v24 }
  0xe3   : > { %v204_v28 = vrot.slane %v195_v25, 7 }
  0xe4   : > { %v209_v31 = vsel %vm202_vm0, %v206_v19, %v208_v26  ;;  %v216_v32 = vsel %vm202_vm0, %v208_v26, 0.0  ;;  %v236_v42 = vrot.slane %v225_v29, 1  ;;  %v266_v43 = vrot.slane %v255_v30, 2 }
  0xe5   : > { %v228_v33 = vmul.f32 %v224_v22, %v209_v31  ;;  %v229_v34 = vmul.f32 %v224_v22, %v216_v32  ;;  %v258_v35 = vmul.f32 %v254_v23, %v209_v31  ;;  %v205_v36 = vsel %vm202_vm0, %v203_v17, %v204_v28 }
  0xe6   : > { %v207_v37 = vsel %vm202_vm0, %v204_v28, %v206_v19  ;;  %v259_v41 = vmul.f32 %v254_v23, %v216_v32  ;;  %v226_v44 = vmul.f32 %v224_v22, %v205_v36  ;;  %v222_v46 = vmul.f32 %v218_v27, %v209_v31 }
  0xe7   : > { %v241_v39 = vrot.slane %v228_v33, 1  ;;  %v243_v40 = vrot.slane %v229_v34, 1  ;;  %v227_v45 = vmul.f32 %v224_v22, %v207_v37  ;;  %v256_v48 = vmul.f32 %v254_v23, %v205_v36 }
  0xe8   : > { %v257_v49 = vmul.f32 %v254_v23, %v207_v37  ;;  %v271_v50 = vrot.slane %v258_v35, 2  ;;  %v220_v51 = vmul.f32 %v218_v27, %v205_v36  ;;  %v237_v52 = vrot.slane %v226_v44, 1 }
  0xe9   : > { %v244_v47 = vsel %vm235_vm1, %v241_v39, %v243_v40  ;;  %v239_v53 = vrot.slane %v227_v45, 1  ;;  %v273_v54 = vrot.slane %v259_v41, 2  ;;  %v221_v55 = vmul.f32 %v218_v27, %v207_v37 }
  0xea   : > { %v267_v56 = vrot.slane %v256_v48, 2  ;;  %v269_v57 = vrot.slane %v257_v49, 2  ;;  %v252_v58 = vadd.f32 %v244_v47, %v222_v46  ;;  %v238_v59 = vsel %vm235_vm1, %v236_v42, %v237_v52 }
  0xeb   : > { %v240_v60 = vsel %vm235_vm1, %v237_v52, %v239_v53  ;;  %v242_v61 = vsel %vm235_vm1, %v239_v53, %v241_v39  ;;  %v249_v62 = vadd.f32 %v238_v59, %v219_v38  ;;  %v274_v12 = vsel %vm265_vm2, %v271_v50, %v273_v54 }
  0xec   : > { %v250_v63 = vadd.f32 %v240_v60, %v220_v51  ;;  %v251_v3 = vadd.f32 %v242_v61, %v221_v55  ;;  %v268_v7 = vsel %vm265_vm2, %v266_v43, %v267_v56  ;;  %v270_v10 = vsel %vm265_vm2, %v267_v56, %v269_v57 }
  0xed   : > { %v272_v11 = vsel %vm265_vm2, %v269_v57, %v271_v50  ;;  %v279_v13 = vadd.f32 %v268_v7, %v249_v62  ;;  %v282_v16 = vadd.f32 %v274_v12, %v252_v58 }
  0xee   : > { %v280_v14 = vadd.f32 %v270_v10, %v250_v63  ;;  %v281_v15 = vadd.f32 %v272_v11, %v251_v3 }
  0xef   : > { %v455_v17 = vmul.f32 -1.442695, %v279_v13  ;;  %v458_v20 = vmul.f32 -1.442695, %v282_v16 }
  0xf0   : > { %v456_v18 = vmul.f32 -1.442695, %v280_v14  ;;  %v457_v19 = vmul.f32 -1.442695, %v281_v15 }
  0xf1   : > { %530 = vpow2.f32 %v455_v17 }
  0xf2   : > { %532 = vpow2.f32 %v456_v18 }
  0xf3   : > { %534 = vpow2.f32 %v457_v19 }
  0xf4   : > { %536 = vpow2.f32 %v458_v20 }
  0xfb   : > { %v531_v21 = vpop.eup %530 }
  0xfc   : > { %v533_v22 = vpop.eup %532  ;;  %v295_v23 = vadd.f32 1.0, %v531_v21 }
  0xfd   : > { %v535_v24 = vpop.eup %534  ;;  %v296_v25 = vadd.f32 1.0, %v533_v22 }
  0xfe   : > { %538 = vrcp.f32 %v295_v23  ;;  %v297_v26 = vadd.f32 1.0, %v535_v24  ;;  %v537_v27 = vpop.eup %536 }
  0xff   : > { %540 = vrcp.f32 %v296_v25  ;;  %v298_v28 = vadd.f32 1.0, %v537_v27 }
 0x100   : > { %542 = vrcp.f32 %v297_v26 }
 0x101   : > { %544 = vrcp.f32 %v298_v28 }
 0x108   : > { %v539_v29 = vpop.eup %538 }
 0x109   : > { %v541_v30 = vpop.eup %540  ;;  %309 = vperm.xlu0 %528, %v539_v29  }
 0x10a   : > { %314 = vperm.xlu1 %529, %v541_v30   ;;  %v543_v31 = vpop.eup %542 }
 0x10b   : > { %v545_v32 = vpop.eup %544 }
 0x10e   : > { %319 = vperm.xlu1 %529, %v543_v31  }
 0x112   : > { %324 = vperm.xlu1 %529, %v545_v32  }
 0x188   : > { %v310_v33 = vpop.permute.xlu0 %309 }
 0x189   : > { %v327_v34 = vmul.f32 %v310_v33, %v830_v2  ;;  %v328_v35 = vmul.f32 %v310_v33, %v834_v4  ;;  %v315_v36 = vpop.permute.xlu1 %314 }
 0x18a   : > { %v329_v37 = vmul.f32 %v315_v36, %v842_v8  ;;  %v330_v38 = vmul.f32 %v315_v36, %v844_v9 }
 0x18b   : > { %335 = vst [vmem:[%s173_s29] sm:$0xff] %v327_v34  ;;  %336 = vst [vmem:[%s173_s29 + $0x8] sm:$0xff] %v328_v35 }
 0x18c   : > { %337 = vst [vmem:[%s173_s29 + $0x10] sm:$0xff] %v329_v37  ;;  %338 = vst [vmem:[%s173_s29 + $0x18] sm:$0xff] %v330_v38 }
 0x18d   : > { %v320_v39 = vpop.permute.xlu1 %319 }
 0x18e   : > { %v331_v40 = vmul.f32 %v320_v39, %v826_v0  ;;  %v332_v2 = vmul.f32 %v320_v39, %v828_v1 }
 0x190   : > { %339 = vst [vmem:[%s173_s29 + $0x20] sm:$0xff] %v331_v40  ;;  %340 = vst [vmem:[%s173_s29 + $0x28] sm:$0xff] %v332_v2 }
 0x191   : > { %v325_v4 = vpop.permute.xlu1 %324 }
 0x192   : > { %v333_v0 = vmul.f32 %v325_v4, %v836_v5  ;;  %v334_v8 = vmul.f32 %v325_v4, %v838_v6 }
 0x194   : > { %341 = vst [vmem:[%s173_s29 + $0x30] sm:$0xff] %v333_v0  ;;  %342 = vst [vmem:[%s173_s29 + $0x38] sm:$0xff] %v334_v8 }
 0x195   : > { %602 = shalt.err (!%p599_p0)
}
 0x196   : > { %s603_s16 = scalar_lea.hbm %s875_s7, 1024  ;;  %s607_s25 = scalar_lea.hbm %s925_s2, 2048 }
 0x197   : > { %p604_p8 = scmp.ne.s32.totalorder %s875_s7, %s603_s16  ;;  %p608_p1 = scmp.lt.u32.totalorder %s875_s7, %s925_s2 }
 0x198   : > { %p609_p2 = scmp.lt.u32.totalorder %s607_s25, %s603_s16  ;;  %p611_p12 = scmp.lt.u32.totalorder %s603_s16, %s875_s7 }
 0x199   : > { %p605_p9 = pnand %p604_p8, %p939_p13 }
 0x19a   : > { %p610_p11 = por %p609_p2, %p608_p1 }
 0x19b   : > { %p606_p10 = pneg %p605_p9 }
 0x19c   : > { %p612_p7 = por %p611_p12, %p610_p11 }
 0x19e   : > { %p613_p3 = pnand %p612_p7, %p606_p10 }
 0x1a0   : > { %616 = shalt.err (!%p613_p3)
}
 0x1a1   : > { %s667_s23 = smov 256   ;;  %s668_s19 = smov 16  }
 0x1a2   : > { %472 = dma.vmem_to_hbm [thread:$0]  (%p939_p13), %s877_s4, 1024, %s875_s7, %s344_s13, %s667_s23, %s667_s23, %s668_s19  }
 0x1a3 PF: > { %s372_s29 = sand.u32 1, %s647_s9   ;;  %p940_p6 = scmp.ne.s32.totalorder %s932_s22, 0 }
 0x1a4   : > { %p941_p4 = scmp.ge.s32.totalorder %s659_s12, 2  ;;  %s373_s30 = scalar_lea.sflag [#allocation4], %s372_s29 }
 0x1a6   : > { %p483_p5 = pnand %p941_p4, %p940_p6 }
 0x1a8   : > { %642 = dma.done.wait (!%p483_p5), %s373_s30, 1024  }
 0x1a9   : > { %644 = vsyncadd (!%p483_p5), %s373_s30, 4294966272  ;;  %p16_p0 = scmp.ge.s32.totalorder %s709_s15, 4   ;;  %s942_s9 = smov %s651_s10 }
 0x1aa   : > { %s943_s10 = smov %s655_s11  ;;  %s944_s11 = smov %s721_s18 }
 0x1ab   : > { %s945_s12 = smov %s709_s15  ;;  %18 = sbr.rel (!%p16_p0) target bundleno = 6 (0x6), region = 78 }
 0x1b2   :  { %378 = vsyncpa [#allocation3], 1 }
 0x1b3   :  { %380 = vsyncpa [#allocation3 + $0x1], 1 }
 0x1b4   :  { %381 = vsyncpa [#allocation4], 1 }
 0x1b5   :  { %383 = vsyncpa [#allocation4 + $0x1], 1 }
 0x1b6   :  { %384 = vsyncpa [#allocation5], 1 }
 0x1b7   :  { %386 = vsyncpa [#allocation5 + $0x1], 1 }

</bundles_post_ra>
